<compile_context>
chip_gen: v7x
topology: tpu7x:2x2x1
jax: 0.10.0
libtpu: 0.0.40
codegen_flags: <defaults>
</compile_context>

<pallas_src>
from functools import partial

import jax
import jax.numpy as jnp
import numpy as np
from jax.experimental import pallas as pl
from jax.experimental.pallas import tpu as pltpu

LANE = 128
SUBLANE = 8


def _round_up(x, m):
    return ((x + m - 1) // m) * m


def _make_mlp_kernel(num_layers):
    """Kernel computing the whole MLP (all matmuls + ReLUs) for one batch tile."""

    def kernel(*refs):
        # refs = (x_tile, W_0..W_{L-1}, b_0..b_{L-1}, out_tile)
        x_ref = refs[0]
        w_refs = refs[1 : 1 + num_layers]
        b_refs = refs[1 + num_layers : 1 + 2 * num_layers]
        out_ref = refs[-1]

        # Activations live in f32 (bias-add / ReLU on the VPU in f32);
        # matmul operands are cast to bf16 for the full-rate MXU path,
        # accumulating in f32.
        h = x_ref[...].astype(jnp.float32)
        for i in range(num_layers):
            w = w_refs[i][...]                      # bf16, VMEM-resident
            b = b_refs[i][...].astype(jnp.float32)  # (1, out_i) broadcasts over rows
            h = jnp.dot(h.astype(w.dtype), w, preferred_element_type=jnp.float32) + b
            if i < num_layers - 1:                  # ReLU after every layer but last
                h = jnp.maximum(h, 0.0)
        out_ref[...] = h.astype(out_ref.dtype)

    return kernel


def mlp_r_forward(x, weights, biases, input_dims, *, tile_b=256,
                  matmul_dtype=jnp.bfloat16):
    """Pallas implementation of MLP_r.forward.

    x       : (B, D_in) float32
    weights : list of (in_i, out_i) arrays (transposed vs torch.nn.Linear.weight)
    biases  : list of (1, out_i) arrays
    returns : (B, *input_dims) float32
    """
    num_layers = len(weights)
    B, d_in = x.shape
    d_out = weights[-1].shape[1]
    assert d_out == int(np.prod(input_dims)), "feature_dim must equal prod(input_dims)"

    # ---- Pad hidden widths to multiples of 128 lanes (zero cols/rows: exact no-op)
    w_p, b_p = [], []
    prev_pad = 0
    for i, (w, b) in enumerate(zip(weights, biases)):
        _, do = w.shape
        out_pad = 0 if i == num_layers - 1 else _round_up(do, LANE) - do
        w = jnp.pad(w, ((0, prev_pad), (0, out_pad)))
        b = jnp.pad(b, ((0, 0), (0, out_pad)))
        w_p.append(w.astype(matmul_dtype))   # store bf16 once, not per-tile
        b_p.append(b.astype(jnp.float32))    # bias/ReLU math stays f32
        prev_pad = out_pad

    # ---- Batch tiling: multiple of 8 sublanes, capped to keep live f32 tiles small
    tile_b = max(SUBLANE, min(int(tile_b), _round_up(B, SUBLANE)))
    tile_b = _round_up(tile_b, SUBLANE)
    B_pad = _round_up(B, tile_b)
    if B_pad != B:
        x = jnp.pad(x, ((0, B_pad - B), (0, 0)))
    nb = B_pad // tile_b

    # ---- VMEM budget: resident params (double-buffered by the pipeline) +
    #      double-buffered x/out tiles + live activations, plus headroom; cap at
    #      48 MiB so it always fits v7x's 64 MiB physical VMEM.
    bytes_params = (sum(w.size * w.dtype.itemsize for w in w_p)
                    + sum(b.size * 4 for b in b_p))
    widths = [d_in] + [w.shape[1] for w in w_p]
    bytes_tiles = 2 * tile_b * d_in * x.dtype.itemsize   # x tile, double-buffered
    bytes_tiles += 2 * tile_b * d_out * 4                # out tile, double-buffered
    bytes_act = 2 * tile_b * max(widths) * 4             # f32 h + bf16 cast copy
    vmem_bytes = int(2 * bytes_params + bytes_tiles + bytes_act) + (4 << 20)
    vmem_bytes = min(max(vmem_bytes, 8 << 20), 48 << 20)

    flops = 2 * B_pad * sum(w.shape[0] * w.shape[1] for w in w_p)
    bytes_accessed = int(B_pad * d_in * x.dtype.itemsize
                         + bytes_params + B_pad * d_out * 4)
    cost = pl.CostEstimate(flops=flops, transcendentals=0,
                           bytes_accessed=bytes_accessed)

    in_specs = [pl.BlockSpec((tile_b, d_in), lambda i: (i, 0))]
    in_specs += [pl.BlockSpec(w.shape, lambda i: (0, 0)) for w in w_p]   # resident
    in_specs += [pl.BlockSpec(b.shape, lambda i: (0, 0)) for b in b_p]   # resident
    out_spec = pl.BlockSpec((tile_b, d_out), lambda i: (i, 0))

    out = pl.pallas_call(
        _make_mlp_kernel(num_layers),
        out_shape=jax.ShapeDtypeStruct((B_pad, d_out), jnp.float32),
        grid=(nb,),
        in_specs=in_specs,
        out_specs=out_spec,
        compiler_params=pltpu.CompilerParams(
            dimension_semantics=("parallel",),   # megacore / 2-TC split on v7x
            vmem_limit_bytes=vmem_bytes,
        ),
        cost_estimate=cost,
    )(x, *w_p, *b_p)

    out = out[:B]
    return out.reshape((B,) + tuple(input_dims))


def build_params(feature_dim, layer_widths, key):
    """Deterministic params matching MLP_r.__init__ shapes.

    lin_dims = flip([feature_dim] + layer_widths); layer i: Linear(lin_dims[i] -> lin_dims[i+1]).
    Uses torch.nn.Linear's default U(-1/sqrt(fan_in), 1/sqrt(fan_in)) init.
    """
    lin_dims = list(np.flip(np.array([feature_dim] + list(layer_widths)))
                    .astype(np.int64))
    weights, biases = [], []
    for i in range(len(layer_widths)):
        d_in, d_out = int(lin_dims[i]), int(lin_dims[i + 1])
        key, kw, kb = jax.random.split(key, 3)
        bound = 1.0 / np.sqrt(d_in)
        w = jax.random.uniform(kw, (d_in, d_out), jnp.float32, -bound, bound)
        b = jax.random.uniform(kb, (1, d_out), jnp.float32, -bound, bound)
        weights.append(w)
        biases.append(b)
    return weights, biases


def reference_forward(x, weights, biases, input_dims, *, matmul_dtype=jnp.float32):
    """Pure-JAX reference. matmul_dtype=bfloat16 mirrors the kernel's MXU path."""
    h = x.astype(jnp.float32)
    for i, (w, b) in enumerate(zip(weights, biases)):
        h = jnp.dot(h.astype(matmul_dtype), w.astype(matmul_dtype),
                    preferred_element_type=jnp.float32) + b.astype(jnp.float32)
        if i < len(weights) - 1:
            h = jnp.maximum(h, 0.0)
    return h.reshape((x.shape[0],) + tuple(input_dims))


if __name__ == "__main__":
    # Module config:
    #   input_dims = (4, 8, 8)  -> feature_dim = 256
    #   layer_widths = [64, 128] -> lin_dims = [128, 64, 256]
    #   network: Linear(128->64) -> ReLU -> Linear(64->256), then view(B, 4, 8, 8)
    input_dims = (4, 8, 8)
    feature_dim = int(np.prod(input_dims))  # 256
    layer_widths = [64, 128]

    key = jax.random.PRNGKey(0)
    key, kx, kp = jax.random.split(key, 3)

    weights, biases = build_params(feature_dim, layer_widths, kp)

    d_in = weights[0].shape[0]  # 128
    B = 20                      # non-multiple of the tile: exercises padding + multi-step grid
    x = jax.random.normal(kx, (B, d_in), jnp.float32)

    fwd = jax.jit(partial(mlp_r_forward, input_dims=input_dims, tile_b=16))
    out = jax.block_until_ready(fwd(x, weights, biases))

    ref_match = reference_forward(x, weights, biases, input_dims,
                                  matmul_dtype=jnp.bfloat16)  # same MXU dtype path
    ref_f32 = reference_forward(x, weights, biases, input_dims,
                                matmul_dtype=jnp.float32)     # full-precision sanity

    assert out.shape == (B,) + input_dims, out.shape
    assert np.allclose(np.asarray(out), np.asarray(ref_match), atol=1e-4, rtol=1e-3), (
        "mismatch vs bf16-matched reference")
    assert np.allclose(np.asarray(out), np.asarray(ref_f32), atol=5e-2, rtol=5e-2), (
        "mismatch vs f32 reference beyond bf16 tolerance")

    print("KERNEL_OK")
</pallas_src>

<mosaic_0001>
module attributes {stable_mosaic.version = 11 : i64} {
  func.func @kernel(%arg0: i32, %arg1: memref<16x128xf32, #tpu.memory_space<vmem>>, %arg2: memref<128x128xbf16, #tpu.memory_space<vmem>>, %arg3: memref<128x256xbf16, #tpu.memory_space<vmem>>, %arg4: memref<1x128xf32, #tpu.memory_space<vmem>>, %arg5: memref<1x256xf32, #tpu.memory_space<vmem>>, %arg6: memref<16x256xf32, #tpu.memory_space<vmem>>) attributes {dimension_semantics = [#tpu.dimension_semantics<parallel>], iteration_bounds = array<i64: 2>, scalar_prefetch = 0 : i64, scratch_operands = 0 : i64, tpu.core_type = #tpu.core_type<tc>, window_params = [{transform_indices = @transform_0, window_bounds = array<i64: 16, 128>}, {pipeline_mode = #tpu.pipeline_mode<synchronous>, transform_indices = @transform_1, window_bounds = array<i64: 128, 128>}, {pipeline_mode = #tpu.pipeline_mode<synchronous>, transform_indices = @transform_2, window_bounds = array<i64: 128, 256>}, {pipeline_mode = #tpu.pipeline_mode<synchronous>, transform_indices = @transform_3, window_bounds = array<i64: 1, 128>}, {pipeline_mode = #tpu.pipeline_mode<synchronous>, transform_indices = @transform_4, window_bounds = array<i64: 1, 256>}, {transform_indices = @transform_5, window_bounds = array<i64: 16, 256>}]} {
    %c0 = arith.constant 0 : index
    %c0_0 = arith.constant 0 : index
    %0 = vector.load %arg1[%c0, %c0_0] : memref<16x128xf32, #tpu.memory_space<vmem>>, vector<16x128xf32>
    %c0_1 = arith.constant 0 : index
    %c0_2 = arith.constant 0 : index
    %1 = vector.load %arg2[%c0_1, %c0_2] : memref<128x128xbf16, #tpu.memory_space<vmem>>, vector<128x128xbf16>
    %c0_3 = arith.constant 0 : index
    %c0_4 = arith.constant 0 : index
    %2 = vector.load %arg4[%c0_3, %c0_4] : memref<1x128xf32, #tpu.memory_space<vmem>>, vector<1x128xf32>
    %3 = arith.truncf %0 : vector<16x128xf32> to vector<16x128xbf16>
    %cst = arith.constant dense<0.000000e+00> : vector<16x128xf32>
    %4 = tpu.matmul %3, %1, %cst {dimension_numbers = #tpu.dot_dimension_numbers<[1], [0], [0], [1], [0, 0, 1, 1], [], []>} : vector<16x128xbf16>, vector<128x128xbf16>, vector<16x128xf32> -> vector<16x128xf32>
    %5 = vector.broadcast %2 : vector<1x128xf32> to vector<16x128xf32>
    %6 = arith.addf %4, %5 : vector<16x128xf32>
    %cst_5 = arith.constant 0.000000e+00 : f32
    %7 = vector.broadcast %cst_5 : f32 to vector<16x128xf32>
    %8 = arith.maximumf %6, %7 : vector<16x128xf32>
    %c0_6 = arith.constant 0 : index
    %c0_7 = arith.constant 0 : index
    %9 = vector.load %arg3[%c0_6, %c0_7] : memref<128x256xbf16, #tpu.memory_space<vmem>>, vector<128x256xbf16>
    %c0_8 = arith.constant 0 : index
    %c0_9 = arith.constant 0 : index
    %10 = vector.load %arg5[%c0_8, %c0_9] : memref<1x256xf32, #tpu.memory_space<vmem>>, vector<1x256xf32>
    %11 = arith.truncf %8 : vector<16x128xf32> to vector<16x128xbf16>
    %cst_10 = arith.constant dense<0.000000e+00> : vector<16x256xf32>
    %12 = tpu.matmul %11, %9, %cst_10 {dimension_numbers = #tpu.dot_dimension_numbers<[1], [0], [0], [1], [0, 0, 1, 1], [], []>} : vector<16x128xbf16>, vector<128x256xbf16>, vector<16x256xf32> -> vector<16x256xf32>
    %13 = vector.broadcast %10 : vector<1x256xf32> to vector<16x256xf32>
    %14 = arith.addf %12, %13 : vector<16x256xf32>
    %c0_11 = arith.constant 0 : index
    %c0_12 = arith.constant 0 : index
    %15 = vector.load %arg6[%c0_11, %c0_12] : memref<16x256xf32, #tpu.memory_space<vmem>>, vector<16x256xf32>
    tpu.vector_store %arg6[%c0_11, %c0_12], %14 {strides = array<i32>} : memref<16x256xf32, #tpu.memory_space<vmem>>, vector<16x256xf32>,
    return
  }
  func.func @transform_0(%arg0: i32) -> (i32, i32) {
    %c0_i32 = arith.constant 0 : i32
    %c0_i32_0 = arith.constant 0 : i32
    return %arg0, %c0_i32 : i32, i32
  }
  func.func @transform_1(%arg0: i32) -> (i32, i32) {
    %c0_i32 = arith.constant 0 : i32
    %c0_i32_0 = arith.constant 0 : i32
    %c0_i32_1 = arith.constant 0 : i32
    return %c0_i32, %c0_i32_0 : i32, i32
  }
  func.func @transform_2(%arg0: i32) -> (i32, i32) {
    %c0_i32 = arith.constant 0 : i32
    %c0_i32_0 = arith.constant 0 : i32
    %c0_i32_1 = arith.constant 0 : i32
    return %c0_i32, %c0_i32_0 : i32, i32
  }
  func.func @transform_3(%arg0: i32) -> (i32, i32) {
    %c0_i32 = arith.constant 0 : i32
    %c0_i32_0 = arith.constant 0 : i32
    %c0_i32_1 = arith.constant 0 : i32
    return %c0_i32, %c0_i32_0 : i32, i32
  }
  func.func @transform_4(%arg0: i32) -> (i32, i32) {
    %c0_i32 = arith.constant 0 : i32
    %c0_i32_0 = arith.constant 0 : i32
    %c0_i32_1 = arith.constant 0 : i32
    return %c0_i32, %c0_i32_0 : i32, i32
  }
  func.func @transform_5(%arg0: i32) -> (i32, i32) {
    %c0_i32 = arith.constant 0 : i32
    %c0_i32_0 = arith.constant 0 : i32
    return %arg0, %c0_i32 : i32, i32
  }
}

</mosaic_0001>

<bundles_post_ra>
// kernel: mlp_r_forward.1
= control target key start
LH: loop header
LB: loop body
LE: loop exit
PB: predicated region body
PF: predicated region fallthrough
CT: control target
= control target key end

     0   :  { %s713_s18 = smov 0   ;;  %s812_s0 = inlined_call_operand.vmem [shape: f32[32,128], index: 0, kind: input, shape index: {}]   ;;  %s813_s1 = inlined_call_operand.vmem [shape: bf16[128,128], index: 1, kind: input, shape index: {}]   ;;  %s814_s2 = inlined_call_operand.vmem [shape: bf16[128,256], index: 2, kind: input, shape index: {}]   ;;  %s815_s3 = inlined_call_operand.vmem [shape: f32[1,128], index: 3, kind: input, shape index: {}]   ;;  %s816_s4 = inlined_call_operand.vmem [shape: f32[1,256], index: 4, kind: input, shape index: {}]   ;;  %s817_s5 = inlined_call_operand.vmem [shape: f32[32,256], index: 5, kind: output, shape index: {}]  }
   0x1 LB: > { %s562_s19 = sadd.s32 4294967295, %s678_s18   ;;  %p566_p0 = scmp.ge.s32.totalorder %s678_s18, 1  ;;  %s678_s18 = sphi %s713_s18, %s15_s18  }
   0x2   : > { %p188_p1 = scmp.lt.s32.totalorder %s678_s18, 3 }
   0x4   : > { %p189_p2 = pnand %p566_p0, %p188_p1 }
   0x5   : > { %v640_v0 = vld [vmem:[%s813_s1] sm:$0xff] (!%p189_p2)   ;;  %v680_v1 = vmov (!%p189_p2), 0.0   ;;  %v641_v2 = vld [vmem:[%s813_s1 + $0x8] sm:$0xff] (!%p189_p2)   ;;  %vm681_vm0 = vmmov (!%p189_p2), 0   ;;  %v642_v3 = vld [vmem:[%s813_s1 + $0x10] sm:$0xff] (!%p189_p2)   ;;  %s567_s30 = sshll.u32 (!%p189_p2), %s562_s19, 1  ;;  %v367_v39 = vlaneseq (!%p189_p2) }
   0x6   : > { %192 = sbr.rel (%p189_p2) target bundleno = 476 (0x1dc), region = 40  ;;  %609 = vmatprep.subr.bf16.mxu0 (!%p189_p2), %v680_v1  ;;  %625 = vmatprep.mubr.msk.bf16.mxu0 (!%p189_p2), %vm681_vm0, %v680_v1  ;;  %v648_v4 = vld [vmem:[%s814_s2 + $0x4] ss:$8 sps:$4 sm:$0xff] (!%p189_p2)   ;;  %v643_v5 = vld [vmem:[%s813_s1 + $0x18] sm:$0xff] (!%p189_p2)   ;;  %v650_v6 = vld [vmem:[%s814_s2] ss:$8 sps:$4 sm:$0xff] (!%p189_p2)  }
   0x7   : > { %610 = vmatpush3.bf16.msra.mxu0 (!%p189_p2), %v640_v0  ;;  %457 = vmatprep.subr.bf16.mxu1 (!%p189_p2), %v648_v4  ;;  %v651_v7 = vld [vmem:[%s814_s2 + $0x14] ss:$8 sps:$4 sm:$0xff] (!%p189_p2)   ;;  %v653_v8 = vld [vmem:[%s814_s2 + $0x10] ss:$8 sps:$4 sm:$0xff] (!%p189_p2)   ;;  %p218_p3 = scmp.lt.s32.totalorder (!%p189_p2), %s567_s30, 3  ;;  %v644_v10 = vld [vmem:[%s813_s1 + $0x20] sm:$0xff] (!%p189_p2)  }
   0x8   : > { %611 = vmatprep.subr.bf16.mxu0 (!%p189_p2), %v680_v1  ;;  %458 = vmatpush1.bf16.msra.mxu1 (!%p189_p2), %v650_v6  ;;  %v654_v9 = vld [vmem:[%s814_s2 + $0x24] ss:$8 sps:$4 sm:$0xff] (!%p189_p2)   ;;  %v656_v11 = vld [vmem:[%s814_s2 + $0x20] ss:$8 sps:$4 sm:$0xff] (!%p189_p2)   ;;  %v657_v12 = vld [vmem:[%s814_s2 + $0x34] ss:$8 sps:$4 sm:$0xff] (!%p189_p2)  }
   0x9   : > { %459 = vmatprep.subr.bf16.mxu1 (!%p189_p2), %v651_v7  ;;  %v645_v13 = vld [vmem:[%s813_s1 + $0x28] sm:$0xff] (!%p189_p2)   ;;  %v659_v14 = vld [vmem:[%s814_s2 + $0x30] ss:$8 sps:$4 sm:$0xff] (!%p189_p2)   ;;  %v663_v18 = vld [vmem:[%s814_s2 + $0x54] ss:$8 sps:$4 sm:$0xff] (!%p189_p2)   ;;  %v682_v28 = vmov (!%p189_p2), 0  }
   0xa   : > { %v660_v15 = vld [vmem:[%s814_s2 + $0x44] ss:$8 sps:$4 sm:$0xff] (!%p189_p2)   ;;  %v646_v16 = vld [vmem:[%s813_s1 + $0x30] sm:$0xff] (!%p189_p2)   ;;  %v662_v17 = vld [vmem:[%s814_s2 + $0x40] ss:$8 sps:$4 sm:$0xff] (!%p189_p2)   ;;  %489 = vmatprep.mubr.bf16.mxu1 (!%p189_p2), %v682_v28  ;;  %v368_v40 = vshrl.u32 (!%p189_p2), %v367_v39, 7 }
   0xb   : > { %612 = vmatpush3.bf16.msra.mxu0 (!%p189_p2), %v641_v2  ;;  %v647_v19 = vld [vmem:[%s813_s1 + $0x38] sm:$0xff] (!%p189_p2)   ;;  %v666_v24 = vld [vmem:[%s814_s2 + $0x64] ss:$8 sps:$4 sm:$0xff] (!%p189_p2)   ;;  %v668_v25 = vld [vmem:[%s814_s2 + $0x60] ss:$8 sps:$4 sm:$0xff] (!%p189_p2)  }
   0xc   : > { %613 = vmatprep.subr.bf16.mxu0 (!%p189_p2), %v680_v1  ;;  %460 = vmatpush1.bf16.msra.mxu1 (!%p189_p2), %v653_v8  ;;  %v665_v22 = vld [vmem:[%s814_s2 + $0x50] ss:$8 sps:$4 sm:$0xff] (!%p189_p2)   ;;  %v669_v26 = vld [vmem:[%s814_s2 + $0x74] ss:$8 sps:$4 sm:$0xff] (!%p189_p2)   ;;  %v572_v29 = vld [vmem:[%s815_s3] ss:$0 sm:$0xff] (!%p189_p2) }
   0xd   : > { %s819_s30 = smov (!%p218_p3, %s567_s30), 3  ;;  %461 = vmatprep.subr.bf16.mxu1 %v654_v9  ;;  %v671_v27 = vld [vmem:[%s814_s2 + $0x70] ss:$8 sps:$4 sm:$0xff]   ;;  %v369_v41 = vsub.s32 0, %v368_v40  ;;  %v364_v42 = vld [vmem:[%s816_s4] sm:$0x3] }
   0xe   : > { %s568_s25 = sshll.u32 %s819_s30, 3  ;;  %v373_v43 = vsub.s32 1, %v368_v40  ;;  %s599_s6 = sshll.u32 %s819_s30, 4 }
   0xf   : > { %614 = vmatpush3.bf16.msra.mxu0 %v642_v3  ;;  %s221_s8 = scalar_lea.vmem %s812_s0, %s568_s25  ;;  %v370_v44 = vrot.slane %v364_v42, %v369_v41  ;;  %s228_s9 = scalar_lea.vmem %s817_s5, %s599_s6 }
  0x10   : > { %615 = vmatprep.subr.bf16.mxu0 %v680_v1  ;;  %462 = vmatpush1.bf16.msra.mxu1 %v656_v11  ;;  %v231_v20 = vld [vmem:[%s221_s8] sm:$0xff]  ;;  %v232_v21 = vld [vmem:[%s221_s8 + $0x8] sm:$0xff]  ;;  %v374_v45 = vrot.slane %v364_v42, %v373_v43 }
  0x11   : > { %463 = vmatprep.subr.bf16.mxu1 %v657_v12  ;;  %v250_v23 = vpack.c.bf16 %v232_v21, %v231_v20 }
  0x13   : > { %616 = vmatpush3.bf16.msra.mxu0 %v643_v5 }
  0x14   : > { %617 = vmatprep.subr.bf16.mxu0 %v680_v1  ;;  %464 = vmatpush1.bf16.msra.mxu1 %v659_v14 }
  0x15   : > { %465 = vmatprep.subr.bf16.mxu1 %v660_v15 }
  0x17   : > { %618 = vmatpush3.bf16.msra.mxu0 %v644_v10 }
  0x18   : > { %619 = vmatprep.subr.bf16.mxu0 %v680_v1  ;;  %466 = vmatpush1.bf16.msra.mxu1 %v662_v17 }
  0x19   : > { %467 = vmatprep.subr.bf16.mxu1 %v663_v18 }
  0x1b   : > { %620 = vmatpush3.bf16.msra.mxu0 %v645_v13 }
  0x1c   : > { %621 = vmatprep.subr.bf16.mxu0 %v680_v1  ;;  %468 = vmatpush1.bf16.msra.mxu1 %v665_v22 }
  0x1d   : > { %469 = vmatprep.subr.bf16.mxu1 %v666_v24 }
  0x1f   : > { %622 = vmatpush3.bf16.msra.mxu0 %v646_v16 }
  0x20   : > { %623 = vmatprep.subr.bf16.mxu0 %v680_v1  ;;  %470 = vmatpush1.bf16.msra.mxu1 %v668_v25 }
  0x21   : > { %471 = vmatprep.subr.bf16.mxu1 %v669_v26 }
  0x23   : > { %624 = vmatpush3.bf16.msra.mxu0 %v647_v19 }
  0x24   : > { %472 = vmatpush1.bf16.msra.mxu1 %v671_v27 }
  0x26   : > { %626 = vmatmul.mubr.bf16.vlgmr.msra.gmra.mrb[0].mxu0 %v250_v23 }
  0xf9   : > { %v339_v30 = vpop.f32.mrb[0].mxu0 }
  0xfa   : > { %v340_v31 = vadd.f32 %v572_v29, %v339_v30  ;;  %v627_v32 = vpop.f32.mrb[1].mxu0 }
  0xfb   : > { %v342_v33 = vpop.f32.mrb[2].mxu0 }
  0xfc   : > { %v343_v34 = vadd.f32 %v572_v29, %v342_v33  ;;  %v628_v35 = vpop.f32.mrb[3].mxu0  ;;  %v346_v36 = vmax.f32 %v340_v31, 0.0 }
  0xfe   : > { %v347_v37 = vmax.f32 %v343_v34, 0.0 }
 0x100   : > { %v365_v38 = vpack.c.bf16 %v347_v37, %v346_v36 }
 0x102   : > { %490 = vmatmul.mubr.bf16.vlgmr.msra.gmra.mrb[0].mxu1 %v365_v38 }
 0x1d5   : > { %v491_v46 = vpop.f32.mrb[0].mxu1 }
 0x1d6   : > { %v492_v47 = vadd.f32 %v491_v46, %v370_v44  ;;  %v493_v48 = vpop.f32.mrb[1].mxu1 }
 0x1d7   : > { %v494_v49 = vadd.f32 %v493_v48, %v374_v45  ;;  %v495_v50 = vpop.f32.mrb[2].mxu1 }
 0x1d8   : > { %500 = vst [vmem:[%s228_s9] sm:$0xff] %v492_v47  ;;  %v496_v51 = vadd.f32 %v495_v50, %v370_v44  ;;  %v497_v52 = vpop.f32.mrb[3].mxu1 }
 0x1d9   : > { %501 = vst [vmem:[%s228_s9 + $0x8] sm:$0xff] %v494_v49  ;;  %v498_v53 = vadd.f32 %v497_v52, %v374_v45 }
 0x1da   : > { %502 = vst [vmem:[%s228_s9 + $0x10] sm:$0xff] %v496_v51 }
 0x1db   : > { %503 = vst [vmem:[%s228_s9 + $0x18] sm:$0xff] %v498_v53 }
 0x1dc PF: > { %s15_s18 = sadd.s32 1, %s678_s18  }
 0x1dd   : > { %p12_p4 = scmp.ge.s32.totalorder %s15_s18, 4  }
 0x1df   :  { %14 = sbr.rel (!%p12_p4) target bundleno = 1 (0x1), region = 70 }

</bundles_post_ra>
